<compile_context>
chip_gen: v6e
topology: v6e:2x2x1
jax: 0.10.0
libtpu: 0.0.40
codegen_flags: <defaults>
</compile_context>

<pallas_src>
import functools

import numpy as np
import jax
import jax.numpy as jnp
from jax.experimental import pallas as pl
from jax.experimental.pallas import tpu as pltpu


def _round_up(x, m):
    return ((x + m - 1) // m) * m


# ----------------------------------------------------------------------------
# Deterministic parameter construction (mirrors the PyTorch __init__)
# ----------------------------------------------------------------------------
def get_fourier_weights_for_mel(window_size, hanning=True):
    frec = np.linspace(-window_size // 2, 0, window_size // 2 + 1)
    time = np.linspace(0, window_size - 1, window_size)
    if hanning:
        hanning_window = np.hanning(window_size)
    filters_cos = []
    filters_sin = []
    for f in frec:
        filters_cos.append(np.cos(2 * np.pi * f * time / window_size))
        filters_sin.append(np.sin(2 * np.pi * f * time / window_size))
    if hanning:
        filters_cos = np.array(filters_cos)[::-1] * hanning_window
        filters_sin = np.array(filters_sin)[::-1] * hanning_window
    else:
        filters_cos = np.array(filters_cos)[::-1]
        filters_sin = np.array(filters_sin)[::-1]
    return (filters_cos, filters_sin)


def _hz_to_mel_slaney(freqs):
    freqs = np.asarray(freqs, dtype=np.float64)
    f_sp = 200.0 / 3
    mels = freqs / f_sp
    min_log_hz = 1000.0
    min_log_mel = min_log_hz / f_sp
    logstep = np.log(6.4) / 27.0
    log_t = freqs >= min_log_hz
    mels = np.where(log_t, min_log_mel + np.log(np.maximum(freqs, 1e-10) / min_log_hz) / logstep, mels)
    return mels


def _mel_to_hz_slaney(mels):
    mels = np.asarray(mels, dtype=np.float64)
    f_sp = 200.0 / 3
    freqs = f_sp * mels
    min_log_hz = 1000.0
    min_log_mel = min_log_hz / f_sp
    logstep = np.log(6.4) / 27.0
    log_t = mels >= min_log_mel
    freqs = np.where(log_t, min_log_hz * np.exp(logstep * (mels - min_log_mel)), freqs)
    return freqs


def mel_filterbank(sr, n_fft, n_mels, fmin=0.0, fmax=None):
    """Equivalent of librosa.filters.mel (slaney scale, slaney norm)."""
    if fmax is None:
        fmax = sr / 2.0
    n_freqs = n_fft // 2 + 1
    fftfreqs = np.linspace(0.0, sr / 2.0, n_freqs)
    min_mel = _hz_to_mel_slaney(fmin)
    max_mel = _hz_to_mel_slaney(fmax)
    mel_pts = np.linspace(min_mel, max_mel, n_mels + 2)
    mel_f = _mel_to_hz_slaney(mel_pts)
    fdiff = np.diff(mel_f)
    ramps = mel_f[:, None] - fftfreqs[None, :]
    weights = np.zeros((n_mels, n_freqs), dtype=np.float64)
    for i in range(n_mels):
        lower = -ramps[i] / fdiff[i]
        upper = ramps[i + 2] / fdiff[i + 1]
        weights[i] = np.maximum(0.0, np.minimum(lower, upper))
    enorm = 2.0 / (mel_f[2 : n_mels + 2] - mel_f[:n_mels])
    weights *= enorm[:, None]
    return weights


# ----------------------------------------------------------------------------
# Pallas kernel: one (batch, row-tile) grid cell
# ----------------------------------------------------------------------------
def mel_spectrogram_kernel(chunks_ref, wcs_ref, mstack_ref, out_ref, *,
                           k, tile_l, in_db):
    """
    chunks_ref : (n_chunks, hop)   raw audio in hop-sized chunks (batch squeezed)
    wcs_ref    : (k, hop, 2F_pad)  stacked, pre-transposed [cos | sin] filters
    mstack_ref : (2F_pad, M_pad)   mel^T duplicated over the cos / sin halves
    out_ref    : (tile_l, M_pad)   lane-dense output tile
    """
    row0 = pl.multiple_of(pl.program_id(1) * tile_l, 8)

    # STFT for this row tile as k hop-aligned shift matmuls:
    #   frame i = audio[i*hop : i*hop + W]  =>  frames @ [cos|sin]^T
    #                                        == sum_j chunks[i+j] @ Wcs[j]
    # (no (tile_l, W) frame materialization; f32 MXU accumulation.)
    y = jnp.dot(chunks_ref[pl.ds(row0, tile_l), :], wcs_ref[0],
                preferred_element_type=jnp.float32)
    for j in range(1, k):                     # k is small & static -> unrolled
        y = y + jnp.dot(chunks_ref[pl.ds(row0 + j, tile_l), :], wcs_ref[j],
                        preferred_element_type=jnp.float32)

    # |STFT|^2: square everything; summing the cos^2 and sin^2 halves is folded
    # into the mel projection (mstack holds mel^T in rows [0:F] and [F:2F],
    # zeros elsewhere), so no lane slicing is needed.
    e = y * y
    mel = jnp.dot(e, mstack_ref[...], preferred_element_type=jnp.float32)

    if in_db:
        # 10*log10(x) in the epilogue (EUP slot; saves an extra HBM pass).
        mel = (10.0 / np.log(10.0)) * jnp.log(mel)

    out_ref[...] = mel


# ----------------------------------------------------------------------------
# Module builder: packs constants once (host/numpy), returns jitted forward(x)
# ----------------------------------------------------------------------------
def make_mel_spectrogram_model(window_size=2048, sr=22050, hop_size=128,
                               n_mels=128, fmin=0.0, fmax=None, in_db=False,
                               tile_l=256, compute_dtype=jnp.float32):
    W, hop, M = window_size, hop_size, n_mels
    F = W // 2 + 1
    k = -(-W // hop)              # number of hop-aligned shift matmuls
    Wk = k * hop                  # W rounded to a hop multiple (zero-padded filters)
    F2 = 2 * F
    F2p = _round_up(F2, 128)      # lane padding for the stacked cos|sin output
    Mp = _round_up(M, 128)        # lane-dense output (unmasked vst)

    cos_np, sin_np = get_fourier_weights_for_mel(W)
    mel_np = mel_filterbank(sr, W, M, fmin=fmin, fmax=fmax)

    # Stacked, pre-transposed Fourier filters: (k, hop, 2F_pad). No in-kernel .T.
    wcs = np.zeros((Wk, F2p), dtype=np.float32)
    wcs[:W, :F] = np.asarray(cos_np, dtype=np.float32).T
    wcs[:W, F:F2] = np.asarray(sin_np, dtype=np.float32).T
    wcs = wcs.reshape(k, hop, F2p)

    # mel^T duplicated over the cos/sin halves; zero padding elsewhere so the
    # padded lanes of the stacked STFT contribute nothing.
    mstack = np.zeros((F2p, Mp), dtype=np.float32)
    mstack[:F, :M] = np.asarray(mel_np, dtype=np.float32).T
    mstack[F:F2, :M] = np.asarray(mel_np, dtype=np.float32).T

    wcs_dev = jnp.asarray(wcs, dtype=compute_dtype)     # bf16 optional (v6e/v7x)
    mstack_dev = jnp.asarray(mstack, dtype=jnp.float32)

    def forward(x):
        B, C, T = x.shape
        assert C == 1, "MelSpectrogramModel expects a single input channel"
        assert T >= W, "input shorter than the analysis window"
        L = (T - W) // hop + 1

        # Row tile: 256 for realistic sizes (MXU-sized, VMEM-safe on v7x's
        # 64 MiB), shrunk for tiny inputs. Always a multiple of 8.
        tl = min(_round_up(tile_l, 8), _round_up(L, 8))
        num_tiles = -(-L // tl)
        L_pad = num_tiles * tl
        n_chunks = _round_up(L_pad + k - 1, 8)

        # Raw audio as hop-sized chunks (free reshape + tiny zero pad): HBM
        # traffic is 1x the audio instead of W/hop x for materialized frames.
        T_needed = n_chunks * hop
        x_flat = x[:, 0, :]
        if T_needed <= T:
            x_flat = x_flat[:, :T_needed]
        else:
            x_flat = jnp.pad(x_flat, ((0, 0), (0, T_needed - T)))
        chunks = x_flat.reshape(B, n_chunks, hop).astype(compute_dtype)

        kernel = functools.partial(mel_spectrogram_kernel,
                                   k=k, tile_l=tl, in_db=in_db)

        out = pl.pallas_call(
            kernel,
            out_shape=jax.ShapeDtypeStruct((B, L_pad, Mp), jnp.float32),
            grid=(B, num_tiles),
            in_specs=[
                # Whole (padded) audio row per batch; block index is constant
                # across the inner row-tile axis -> fetched once per batch.
                pl.BlockSpec((None, n_chunks, hop), lambda b, l: (b, 0, 0)),
                # Constant weights: fetched once, resident in VMEM.
                pl.BlockSpec((k, hop, F2p), lambda b, l: (0, 0, 0)),
                pl.BlockSpec((F2p, Mp), lambda b, l: (0, 0)),
            ],
            out_specs=pl.BlockSpec((None, tl, Mp), lambda b, l: (b, l, 0)),
            compiler_params=pltpu.CompilerParams(
                dimension_semantics=("parallel", "parallel")),
        )(chunks, wcs_dev, mstack_dev)

        # Small epilogue: drop padding, go to PyTorch's (B, M, L) layout.
        return jnp.transpose(out[:, :L, :M], (0, 2, 1))

    return jax.jit(forward)


# ----------------------------------------------------------------------------
if __name__ == "__main__":
    # Small but consistent configuration.
    window_size = 256
    hop_size = 64
    n_mels = 64
    sr = 22050
    B = 2
    L = 8
    T = (L - 1) * hop_size + window_size  # 704

    model = make_mel_spectrogram_model(window_size=window_size, sr=sr,
                                       hop_size=hop_size, n_mels=n_mels,
                                       in_db=False)

    key = jax.random.PRNGKey(0)
    x = jax.random.normal(key, (B, 1, T), dtype=jnp.float32)

    out = jax.block_until_ready(model(x))
    assert out.shape == (B, n_mels, L)

    # Independent reference: straightforward framed conv in numpy.
    cos_np, sin_np = get_fourier_weights_for_mel(window_size)
    mel_np = mel_filterbank(sr, window_size, n_mels)
    xn = np.asarray(x)[:, 0, :]
    idx = np.arange(L)[:, None] * hop_size + np.arange(window_size)[None, :]
    frames = xn[:, idx]                                          # (B, L, W)
    c = frames @ np.asarray(cos_np, np.float32).T
    s = frames @ np.asarray(sin_np, np.float32).T
    stft = c * c + s * s                                         # (B, L, F)
    ref = np.einsum("mf,blf->bml", np.asarray(mel_np, np.float32), stft)
    np.testing.assert_allclose(np.asarray(out), ref, rtol=5e-4, atol=5e-3)

    print("KERNEL_OK")
</pallas_src>

<mosaic_0001>
module attributes {stable_mosaic.version = 11 : i64} {
  func.func @mel_spectrogram_kernel(%arg0: i32, %arg1: i32, %arg2: memref<1x16x64xf32, #tpu.memory_space<vmem>>, %arg3: memref<4x64x384xf32, #tpu.memory_space<vmem>>, %arg4: memref<384x128xf32, #tpu.memory_space<vmem>>, %arg5: memref<1x8x128xf32, #tpu.memory_space<vmem>>) attributes {dimension_semantics = [#tpu.dimension_semantics<parallel>, #tpu.dimension_semantics<parallel>], iteration_bounds = array<i64: 2, 1>, scalar_prefetch = 0 : i64, scratch_operands = 0 : i64, tpu.core_type = #tpu.core_type<tc>, window_params = [{transform_indices = @transform_0, window_bounds = array<i64: 1, 16, 64>}, {pipeline_mode = #tpu.pipeline_mode<synchronous>, transform_indices = @transform_1, window_bounds = array<i64: 4, 64, 384>}, {pipeline_mode = #tpu.pipeline_mode<synchronous>, transform_indices = @transform_2, window_bounds = array<i64: 384, 128>}, {transform_indices = @transform_3, window_bounds = array<i64: 1, 8, 128>}]} {
    %c8_i32 = arith.constant 8 : i32
    %0 = arith.muli %arg1, %c8_i32 : i32
    %1 = tpu.assume_multiple %0, 8 : i32
    %c0 = arith.constant 0 : index
    %2 = arith.index_cast %1 : i32 to index
    %c0_0 = arith.constant 0 : index
    %3 = vector.load %arg2[%c0, %2, %c0_0] : memref<1x16x64xf32, #tpu.memory_space<vmem>>, vector<1x8x64xf32>
    %4 = vector.shape_cast %3 : vector<1x8x64xf32> to vector<8x64xf32>
    %c0_1 = arith.constant 0 : index
    %c0_2 = arith.constant 0 : index
    %c0_3 = arith.constant 0 : index
    %5 = vector.load %arg3[%c0_1, %c0_2, %c0_3] : memref<4x64x384xf32, #tpu.memory_space<vmem>>, vector<1x64x384xf32>
    %6 = vector.shape_cast %5 : vector<1x64x384xf32> to vector<64x384xf32>
    %cst = arith.constant dense<0.000000e+00> : vector<8x384xf32>
    %7 = tpu.matmul %4, %6, %cst {dimension_numbers = #tpu.dot_dimension_numbers<[1], [0], [0], [1], [0, 0, 1, 1], [], []>} : vector<8x64xf32>, vector<64x384xf32>, vector<8x384xf32> -> vector<8x384xf32>
    %c1_i32 = arith.constant 1 : i32
    %8 = arith.addi %1, %c1_i32 : i32
    %c0_4 = arith.constant 0 : index
    %9 = arith.index_cast %8 : i32 to index
    %c0_5 = arith.constant 0 : index
    %10 = vector.load %arg2[%c0_4, %9, %c0_5] : memref<1x16x64xf32, #tpu.memory_space<vmem>>, vector<1x8x64xf32>
    %11 = vector.shape_cast %10 : vector<1x8x64xf32> to vector<8x64xf32>
    %c1 = arith.constant 1 : index
    %c0_6 = arith.constant 0 : index
    %c0_7 = arith.constant 0 : index
    %12 = vector.load %arg3[%c1, %c0_6, %c0_7] : memref<4x64x384xf32, #tpu.memory_space<vmem>>, vector<1x64x384xf32>
    %13 = vector.shape_cast %12 : vector<1x64x384xf32> to vector<64x384xf32>
    %cst_8 = arith.constant dense<0.000000e+00> : vector<8x384xf32>
    %14 = tpu.matmul %11, %13, %cst_8 {dimension_numbers = #tpu.dot_dimension_numbers<[1], [0], [0], [1], [0, 0, 1, 1], [], []>} : vector<8x64xf32>, vector<64x384xf32>, vector<8x384xf32> -> vector<8x384xf32>
    %15 = arith.addf %7, %14 : vector<8x384xf32>
    %c2_i32 = arith.constant 2 : i32
    %16 = arith.addi %1, %c2_i32 : i32
    %c0_9 = arith.constant 0 : index
    %17 = arith.index_cast %16 : i32 to index
    %c0_10 = arith.constant 0 : index
    %18 = vector.load %arg2[%c0_9, %17, %c0_10] : memref<1x16x64xf32, #tpu.memory_space<vmem>>, vector<1x8x64xf32>
    %19 = vector.shape_cast %18 : vector<1x8x64xf32> to vector<8x64xf32>
    %c2 = arith.constant 2 : index
    %c0_11 = arith.constant 0 : index
    %c0_12 = arith.constant 0 : index
    %20 = vector.load %arg3[%c2, %c0_11, %c0_12] : memref<4x64x384xf32, #tpu.memory_space<vmem>>, vector<1x64x384xf32>
    %21 = vector.shape_cast %20 : vector<1x64x384xf32> to vector<64x384xf32>
    %cst_13 = arith.constant dense<0.000000e+00> : vector<8x384xf32>
    %22 = tpu.matmul %19, %21, %cst_13 {dimension_numbers = #tpu.dot_dimension_numbers<[1], [0], [0], [1], [0, 0, 1, 1], [], []>} : vector<8x64xf32>, vector<64x384xf32>, vector<8x384xf32> -> vector<8x384xf32>
    %23 = arith.addf %15, %22 : vector<8x384xf32>
    %c3_i32 = arith.constant 3 : i32
    %24 = arith.addi %1, %c3_i32 : i32
    %c0_14 = arith.constant 0 : index
    %25 = arith.index_cast %24 : i32 to index
    %c0_15 = arith.constant 0 : index
    %26 = vector.load %arg2[%c0_14, %25, %c0_15] : memref<1x16x64xf32, #tpu.memory_space<vmem>>, vector<1x8x64xf32>
    %27 = vector.shape_cast %26 : vector<1x8x64xf32> to vector<8x64xf32>
    %c3 = arith.constant 3 : index
    %c0_16 = arith.constant 0 : index
    %c0_17 = arith.constant 0 : index
    %28 = vector.load %arg3[%c3, %c0_16, %c0_17] : memref<4x64x384xf32, #tpu.memory_space<vmem>>, vector<1x64x384xf32>
    %29 = vector.shape_cast %28 : vector<1x64x384xf32> to vector<64x384xf32>
    %cst_18 = arith.constant dense<0.000000e+00> : vector<8x384xf32>
    %30 = tpu.matmul %27, %29, %cst_18 {dimension_numbers = #tpu.dot_dimension_numbers<[1], [0], [0], [1], [0, 0, 1, 1], [], []>} : vector<8x64xf32>, vector<64x384xf32>, vector<8x384xf32> -> vector<8x384xf32>
    %31 = arith.addf %23, %30 : vector<8x384xf32>
    %32 = arith.mulf %31, %31 : vector<8x384xf32>
    %c0_19 = arith.constant 0 : index
    %c0_20 = arith.constant 0 : index
    %33 = vector.load %arg4[%c0_19, %c0_20] : memref<384x128xf32, #tpu.memory_space<vmem>>, vector<384x128xf32>
    %cst_21 = arith.constant dense<0.000000e+00> : vector<8x128xf32>
    %34 = tpu.matmul %32, %33, %cst_21 {dimension_numbers = #tpu.dot_dimension_numbers<[1], [0], [0], [1], [0, 0, 1, 1], [], []>} : vector<8x384xf32>, vector<384x128xf32>, vector<8x128xf32> -> vector<8x128xf32>
    %c0_22 = arith.constant 0 : index
    %c0_23 = arith.constant 0 : index
    %c0_24 = arith.constant 0 : index
    %35 = vector.load %arg5[%c0_22, %c0_23, %c0_24] : memref<1x8x128xf32, #tpu.memory_space<vmem>>, vector<1x8x128xf32>
    %36 = vector.shape_cast %35 : vector<1x8x128xf32> to vector<8x128xf32>
    %37 = vector.shape_cast %34 : vector<8x128xf32> to vector<1x8x128xf32>
    tpu.vector_store %arg5[%c0_22, %c0_23, %c0_24], %37 {strides = array<i32>} : memref<1x8x128xf32, #tpu.memory_space<vmem>>, vector<1x8x128xf32>,
    return
  }
  func.func @transform_0(%arg0: i32, %arg1: i32) -> (i32, i32, i32) {
    %c0_i32 = arith.constant 0 : i32
    %c0_i32_0 = arith.constant 0 : i32
    %c0_i32_1 = arith.constant 0 : i32
    return %arg0, %c0_i32, %c0_i32_0 : i32, i32, i32
  }
  func.func @transform_1(%arg0: i32, %arg1: i32) -> (i32, i32, i32) {
    %c0_i32 = arith.constant 0 : i32
    %c0_i32_0 = arith.constant 0 : i32
    %c0_i32_1 = arith.constant 0 : i32
    %c0_i32_2 = arith.constant 0 : i32
    return %c0_i32, %c0_i32_0, %c0_i32_1 : i32, i32, i32
  }
  func.func @transform_2(%arg0: i32, %arg1: i32) -> (i32, i32) {
    %c0_i32 = arith.constant 0 : i32
    %c0_i32_0 = arith.constant 0 : i32
    %c0_i32_1 = arith.constant 0 : i32
    return %c0_i32, %c0_i32_0 : i32, i32
  }
  func.func @transform_3(%arg0: i32, %arg1: i32) -> (i32, i32, i32) {
    %c0_i32 = arith.constant 0 : i32
    %c0_i32_0 = arith.constant 0 : i32
    return %arg0, %arg1, %c0_i32 : i32, i32, i32
  }
}

</mosaic_0001>

<bundles_post_ra>
// kernel: forward.1
= control target key start
LH: loop header
LB: loop body
LE: loop exit
PB: predicated region body
PF: predicated region fallthrough
CT: control target
= control target key end

     0   :  { %8 = vsyncpa [#allocation3], 0  ;;  %s1762_s0 = inlined_call_operand.vmem [shape: f32[2,16,64], index: 0, kind: input, shape index: {}]   ;;  %s1763_s1 = inlined_call_operand.hbm [shape: f32[4,64,384], index: 1, kind: input, shape index: {}]   ;;  %s1764_s2 = inlined_call_operand.hbm [shape: f32[384,128], index: 2, kind: input, shape index: {}]   ;;  %s1765_s3 = inlined_call_operand.vmem [shape: f32[2,8,128], index: 3, kind: output, shape index: {}]  }
   0x1   :  { %9 = vsyncpa [#allocation5], 0  ;;  %s1598_s12 = smov 0   ;;  %s1600_s13 = smov 0  }
   0x2   :  { %s1602_s14 = smov 0  }
   0x3 LB: > { %s1210_s15 = sadd.s32 4294967295, %s1568_s14   ;;  %s27_s16 = sadd.s32 1, %s1564_s13  ;;  %s1568_s14 = sphi %s1602_s14, %s15_s14   ;;  %s1564_s13 = sphi %s1600_s13, %s1770_s13   ;;  %s1560_s12 = sphi %s1598_s12, %s1769_s12  }
   0x4   : > { %p29_p0 = scmp.ge.s32.totalorder %s27_s16, 2  ;;  %p1212_p1 = scmp.ge.s32.totalorder %s1568_s14, 1 }
   0x5   : > { %p128_p2 = scmp.lt.s32.totalorder %s1568_s14, 3  ;;  %p1623_p4 = scmp.eq.s32.totalorder %s1210_s15, 0 }
   0x6   : > { %s1772_s16 = smov (%p29_p0, %s27_s16), 0  ;;  %s1570_s19 = smov [#allocation2]  }
   0x7   : > { %p1619_p3 = pnand %p1212_p1, %p128_p2  ;;  %s140_s20 = sshll.u32 %s1570_s19, 4  ;;  %s141_s20 = int_to_ptr.vmem [resolvable:$true] %s140_s20 }
   0x8   : > { %s1571_s22 = smov [#allocation4]   ;;  %s1497_s24 = scalar_lea.vmem %s141_s20, 12288 }
   0x9   : > { %p1443_p5 = pneg %p1619_p3  ;;  %s153_s23 = sshll.u32 %s1571_s22, 4  ;;  %s154_s23 = int_to_ptr.vmem [resolvable:$true] %s153_s23 }
   0xa   : > { %p1498_p8 = scmp.ne.s32.totalorder %s141_s20, %s1497_s24  ;;  %p1505_p11 = scmp.lt.s32.totalorder %s141_s20, %s141_s20 }
   0xb   : > { %p1631_p6 = pnand %p1623_p4, %p1443_p5  ;;  %p1506_p12 = scmp.lt.s32.totalorder %s1497_s24, %s1497_s24 }
   0xd   : > { %p1488_p7 = pneg %p1631_p6  ;;  %p1507_p13 = por %p1506_p12, %p1505_p11 }
   0xf   : > { %p1500_p9 = pnand %p1498_p8, %p1488_p7 }
  0x11   : > { %p1501_p10 = pneg %p1500_p9 }
  0x13   : > { %p1508_p0 = pnand %p1507_p13, %p1501_p10 }
  0x15   : > { %1511 = shalt.err (!%p1508_p0)
}
  0x16   : > { %s1572_s25 = smov 384   ;;  %s1573_s26 = smov 24  }
  0x17   : > { %1446 = dma.hbm_to_vmem [thread:$0]  (!%p1631_p6), %s1763_s1, 12288, %s141_s20, [#allocation3], %s1572_s25, %s1572_s25, %s1573_s26  }
  0x18   : > { %s1523_s29 = scalar_lea.vmem %s154_s23, 6144  ;;  %p1531_p8 = scmp.lt.s32.totalorder %s154_s23, %s154_s23 }
  0x19   : > { %p1524_p1 = scmp.ne.s32.totalorder %s154_s23, %s1523_s29  ;;  %p1532_p9 = scmp.lt.s32.totalorder %s1523_s29, %s1523_s29 }
  0x1b   : > { %p1526_p2 = pnand %p1524_p1, %p1488_p7  ;;  %p1533_p11 = por %p1532_p9, %p1531_p8 }
  0x1d   : > { %p1527_p5 = pneg %p1526_p2 }
  0x1f   : > { %p1534_p10 = pnand %p1533_p11, %p1527_p5 }
  0x21   : > { %1537 = shalt.err (!%p1534_p10)
}
  0x22   : > { %s1574_s30 = smov 128   ;;  %s1575_s4 = smov 8  }
  0x23   : > { %1449 = dma.hbm_to_vmem [thread:$0]  (!%p1631_p6), %s1764_s2, 6144, %s154_s23, [#allocation5], %s1574_s30, %s1574_s30, %s1575_s4  }
  0x24   : > { %177 = sbr.rel (%p1619_p3) target bundleno = 516 (0x204), region = 32 }
  0x29   : > { %1551 = dma.done.wait (%p1623_p4), [#allocation3], 12288  }
  0x2a   : > { %1553 = vsyncadd (%p1623_p4), [#allocation3], 4294955008 }
  0x2b   : > { %1555 = dma.done.wait (%p1623_p4), [#allocation5], 6144  }
  0x2c   : > { %1557 = vsyncadd (%p1623_p4), [#allocation5], 4294961152  ;;  %v1576_v0 = vmov 0.0   ;;  %vm1577_vm0 = vmmov 0   ;;  %v272_v1 = vld [vmem:[#allocation2 + $0x170] sm:$0xff]  ;;  %v273_v2 = vld [vmem:[#allocation2 + $0x178] sm:$0xff] }
  0x2d   : > { %1324 = vmatprep.subr.mxu1 %v1576_v0  ;;  %342 = vmatprep.mubr.f32.mxu0 %v1576_v0  ;;  %v271_v3 = vld [vmem:[#allocation2 + $0x168] sm:$0xff]  ;;  %p207_p3 = scmp.lt.s32.totalorder %s1560_s12, 1  ;;  %v269_v4 = vld [vmem:[#allocation2 + $0x158] sm:$0xff]  ;;  %v270_v5 = vld [vmem:[#allocation2 + $0x160] sm:$0xff]  ;;  %vm274_vm1 = vcmask 523264  }
  0x2e   : > { %1340 = vmatprep.mubr.msk.f32.mxu1 %vm1577_vm0, %v1576_v0  ;;  %294 = vmatprep.subr.mxu0 %v272_v1  ;;  %v268_v6 = vld [vmem:[#allocation2 + $0x150] sm:$0xff]  ;;  %v266_v7 = vld [vmem:[#allocation2 + $0x140] sm:$0xff]  ;;  %v267_v8 = vld [vmem:[#allocation2 + $0x148] sm:$0xff] }
  0x2f   : > { %1325 = vmatpush3.msra.mxu1 %v273_v2  ;;  %295 = vmatpush1.msra.mxu0 %v271_v3  ;;  %v265_v9 = vld [vmem:[#allocation2 + $0x138] sm:$0xff]  ;;  %v263_v10 = vld [vmem:[#allocation2 + $0x128] sm:$0xff]  ;;  %v264_v11 = vld [vmem:[#allocation2 + $0x130] sm:$0xff]  ;;  %s1774_s12 = smov (!%p207_p3, %s1560_s12), 1 }
  0x30   : > { %1326 = vmatprep.subr.mxu1 %v1576_v0  ;;  %296 = vmatprep.subr.mxu0 %v269_v4  ;;  %v262_v12 = vld [vmem:[#allocation2 + $0x120] sm:$0xff]  ;;  %v260_v13 = vld [vmem:[#allocation2 + $0x110] sm:$0xff]  ;;  %v261_v14 = vld [vmem:[#allocation2 + $0x118] sm:$0xff]  ;;  %s1235_s7 = sshll.u32 %s1774_s12, 4  ;;  %s1221_s11 = sshll.u32 %s1774_s12, 3 }
  0x31   : > { %1327 = vmatpush3.msra.mxu1 %v270_v5  ;;  %297 = vmatpush1.msra.mxu0 %v268_v6  ;;  %v259_v15 = vld [vmem:[#allocation2 + $0x108] sm:$0xff]  ;;  %v257_v16 = vld [vmem:[#allocation2 + $0xf8] sm:$0xff]  ;;  %v258_v17 = vld [vmem:[#allocation2 + $0x100] sm:$0xff]  ;;  %s1682_s10 = scalar_lea.vmem %s1762_s0, %s1235_s7  ;;  %s218_s18 = scalar_lea.vmem %s1765_s3, %s1221_s11 }
  0x32   : > { %1328 = vmatprep.subr.mxu1 %v1576_v0  ;;  %298 = vmatprep.subr.mxu0 %v266_v7  ;;  %v256_v18 = vld [vmem:[#allocation2 + $0xf0] sm:$0xff]  ;;  %v254_v19 = vld [vmem:[#allocation2 + $0xe0] sm:$0xff]  ;;  %v255_v20 = vld [vmem:[#allocation2 + $0xe8] sm:$0xff] }
  0x33   : > { %1329 = vmatpush3.msra.mxu1 %v267_v8  ;;  %299 = vmatpush1.msra.mxu0 %v265_v9  ;;  %v253_v21 = vld [vmem:[#allocation2 + $0xd8] sm:$0xff]  ;;  %v251_v22 = vld [vmem:[#allocation2 + $0xc8] sm:$0xff]  ;;  %v252_v23 = vld [vmem:[#allocation2 + $0xd0] sm:$0xff] }
  0x34   : > { %1330 = vmatprep.subr.mxu1 %v1576_v0  ;;  %300 = vmatprep.subr.mxu0 %v263_v10  ;;  %v250_v24 = vld [vmem:[#allocation2 + $0xc0] sm:$0xff]  ;;  %v244_v26 = vld [vmem:[#allocation2 + $0xb0] sm:$0xff]  ;;  %v245_v27 = vld [vmem:[#allocation2 + $0xb8] sm:$0xff] }
  0x35   : > { %1331 = vmatpush3.msra.mxu1 %v264_v11  ;;  %301 = vmatpush1.msra.mxu0 %v262_v12  ;;  %v1222_v25 = vld [vmem:[%s1682_s10 + $0x1] sm:$0xff]  ;;  %v241_v29 = vld [vmem:[#allocation2 + $0x98] sm:$0xff]  ;;  %v240_v31 = vld [vmem:[#allocation2 + $0x90] sm:$0xff] }
  0x36   : > { %1332 = vmatprep.subr.mxu1 %v1576_v0  ;;  %302 = vmatprep.subr.mxu0 %v260_v13  ;;  %v243_v28 = vld [vmem:[#allocation2 + $0xa8] sm:$0xff]  ;;  %v242_v30 = vld [vmem:[#allocation2 + $0xa0] sm:$0xff]  ;;  %v237_v34 = vld [vmem:[#allocation2 + $0x78] sm:$0xff] }
  0x37   : > { %1333 = vmatpush3.msra.mxu1 %v261_v14  ;;  %303 = vmatpush1.msra.mxu0 %v259_v15  ;;  %v238_v32 = vld [vmem:[#allocation2 + $0x80] sm:$0xff]  ;;  %v239_v33 = vld [vmem:[#allocation2 + $0x88] sm:$0xff]  ;;  %v236_v36 = vld [vmem:[#allocation2 + $0x70] sm:$0xff] }
  0x38   : > { %1334 = vmatprep.subr.mxu1 %v1576_v0  ;;  %304 = vmatprep.subr.mxu0 %v257_v16  ;;  %v235_v35 = vld [vmem:[#allocation2 + $0x68] sm:$0xff]  ;;  %v234_v37 = vld [vmem:[#allocation2 + $0x60] sm:$0xff]  ;;  %v232_v38 = vld [vmem:[#allocation2 + $0x50] sm:$0xff] }
  0x39   : > { %1335 = vmatpush3.msra.mxu1 %v258_v17  ;;  %305 = vmatpush1.msra.mxu0 %v256_v18  ;;  %v233_v39 = vld [vmem:[#allocation2 + $0x58] sm:$0xff]  ;;  %v231_v40 = vld [vmem:[#allocation2 + $0x48] sm:$0xff]  ;;  %v230_v42 = vld [vmem:[#allocation2 + $0x40] sm:$0xff] }
  0x3a   : > { %1336 = vmatprep.subr.mxu1 %v1576_v0  ;;  %306 = vmatprep.subr.mxu0 %v254_v19  ;;  %v229_v41 = vld [vmem:[#allocation2 + $0x38] sm:$0xff]  ;;  %v228_v43 = vld [vmem:[#allocation2 + $0x30] sm:$0xff]  ;;  %v226_v44 = vld [vmem:[#allocation2 + $0x20] sm:$0xff] }
  0x3b   : > { %1337 = vmatpush3.msra.mxu1 %v255_v20  ;;  %307 = vmatpush1.msra.mxu0 %v253_v21  ;;  %v227_v45 = vld [vmem:[#allocation2 + $0x28] sm:$0xff]  ;;  %v225_v46 = vld [vmem:[#allocation2 + $0x18] sm:$0xff]  ;;  %v224_v48 = vld [vmem:[#allocation2 + $0x10] sm:$0xff] }
  0x3c   : > { %1338 = vmatprep.subr.mxu1 %v1576_v0  ;;  %308 = vmatprep.subr.mxu0 %v251_v22  ;;  %v223_v47 = vld [vmem:[#allocation2 + $0x8] sm:$0xff]  ;;  %v222_v49 = vld [vmem:[#allocation2] sm:$0xff]  ;;  %v589_v51 = vld [vmem:[#allocation2 + $0x230] sm:$0xff] }
  0x3d   : > { %1339 = vmatpush3.msra.mxu1 %v252_v23  ;;  %309 = vmatpush1.msra.mxu0 %v250_v24  ;;  %v221_v50 = vld [vmem:[%s1682_s10] sm:$0xff]  ;;  %v590_v52 = vld [vmem:[#allocation2 + $0x238] sm:$0xff]  ;;  %v588_v53 = vld [vmem:[#allocation2 + $0x228] sm:$0xff] }
  0x3e   : > { %1343 = vmatprep.subr.mxu1 %v1576_v0  ;;  %1223 = vmatmul.mubr.msk.f32.vlgmr.msra.gmra.mxu0 %vm274_vm1, %v1222_v25  ;;  %v586_v54 = vld [vmem:[#allocation2 + $0x218] sm:$0xff]  ;;  %v587_v55 = vld [vmem:[#allocation2 + $0x220] sm:$0xff]  ;;  %v585_v56 = vld [vmem:[#allocation2 + $0x210] sm:$0xff] }
  0x3f   : > { %1341 = vmatmul.mubr.msk.f32.vlgmr.msra.gmra.mxu1 %vm274_vm1, %v1222_v25  ;;  %438 = vmatprep.subr.mxu0 %v244_v26  ;;  %v583_v57 = vld [vmem:[#allocation2 + $0x200] sm:$0xff]  ;;  %v584_v58 = vld [vmem:[#allocation2 + $0x208] sm:$0xff]  ;;  %v582_v59 = vld [vmem:[#allocation2 + $0x1f8] sm:$0xff] }
  0x40   : > { %1344 = vmatpush3.msra.mxu1 %v245_v27  ;;  %439 = vmatpush1.msra.mxu0 %v243_v28  ;;  %v580_v60 = vld [vmem:[#allocation2 + $0x1e8] sm:$0xff]  ;;  %v581_v61 = vld [vmem:[#allocation2 + $0x1f0] sm:$0xff]  ;;  %v579_v62 = vld [vmem:[#allocation2 + $0x1e0] sm:$0xff] }
  0x41   : > { %1345 = vmatprep.subr.mxu1 %v1576_v0  ;;  %440 = vmatprep.subr.mxu0 %v241_v29  ;;  %v577_v63 = vld [vmem:[#allocation2 + $0x1d0] sm:$0xff]  ;;  %v578_v1 = vld [vmem:[#allocation2 + $0x1d8] sm:$0xff]  ;;  %v576_v2 = vld [vmem:[#allocation2 + $0x1c8] sm:$0xff] }
  0x42   : > { %1346 = vmatpush3.msra.mxu1 %v242_v30  ;;  %441 = vmatpush1.msra.mxu0 %v240_v31  ;;  %v574_v3 = vld [vmem:[#allocation2 + $0x1b8] sm:$0xff]  ;;  %v575_v4 = vld [vmem:[#allocation2 + $0x1c0] sm:$0xff]  ;;  %v573_v5 = vld [vmem:[#allocation2 + $0x1b0] sm:$0xff] }
  0x43   : > { %1347 = vmatprep.subr.mxu1 %v1576_v0  ;;  %442 = vmatprep.subr.mxu0 %v238_v32  ;;  %v571_v6 = vld [vmem:[#allocation2 + $0x1a0] sm:$0xff]  ;;  %v572_v7 = vld [vmem:[#allocation2 + $0x1a8] sm:$0xff]  ;;  %v570_v8 = vld [vmem:[#allocation2 + $0x198] sm:$0xff] }
  0x44   : > { %1348 = vmatpush3.msra.mxu1 %v239_v33  ;;  %443 = vmatpush1.msra.mxu0 %v237_v34  ;;  %v568_v9 = vld [vmem:[#allocation2 + $0x188] sm:$0xff]  ;;  %v569_v10 = vld [vmem:[#allocation2 + $0x190] sm:$0xff]  ;;  %v567_v11 = vld [vmem:[#allocation2 + $0x180] sm:$0xff] }
  0x45   : > { %1349 = vmatprep.subr.mxu1 %v1576_v0  ;;  %444 = vmatprep.subr.mxu0 %v235_v35  ;;  %v1227_v12 = vld [vmem:[%s1682_s10 + $0x2] sm:$0xff]  ;;  %v764_v13 = vld [vmem:[#allocation2 + $0x2f0] sm:$0xff]  ;;  %v765_v14 = vld [vmem:[#allocation2 + $0x2f8] sm:$0xff] }
  0x46   : > { %1350 = vmatpush3.msra.mxu1 %v236_v36  ;;  %445 = vmatpush1.msra.mxu0 %v234_v37  ;;  %v763_v15 = vld [vmem:[#allocation2 + $0x2e8] sm:$0xff]  ;;  %v761_v16 = vld [vmem:[#allocation2 + $0x2d8] sm:$0xff]  ;;  %v762_v17 = vld [vmem:[#allocation2 + $0x2e0] sm:$0xff] }
  0x47   : > { %1351 = vmatprep.subr.mxu1 %v1576_v0  ;;  %446 = vmatprep.subr.mxu0 %v232_v38  ;;  %v760_v18 = vld [vmem:[#allocation2 + $0x2d0] sm:$0xff]  ;;  %v758_v19 = vld [vmem:[#allocation2 + $0x2c0] sm:$0xff]  ;;  %v759_v20 = vld [vmem:[#allocation2 + $0x2c8] sm:$0xff] }
  0x48   : > { %1352 = vmatpush3.msra.mxu1 %v233_v39  ;;  %447 = vmatpush1.msra.mxu0 %v231_v40  ;;  %v757_v21 = vld [vmem:[#allocation2 + $0x2b8] sm:$0xff]  ;;  %v755_v22 = vld [vmem:[#allocation2 + $0x2a8] sm:$0xff]  ;;  %v756_v23 = vld [vmem:[#allocation2 + $0x2b0] sm:$0xff] }
  0x49   : > { %1353 = vmatprep.subr.mxu1 %v1576_v0  ;;  %448 = vmatprep.subr.mxu0 %v229_v41  ;;  %v754_v24 = vld [vmem:[#allocation2 + $0x2a0] sm:$0xff]  ;;  %v752_v25 = vld [vmem:[#allocation2 + $0x290] sm:$0xff]  ;;  %v753_v26 = vld [vmem:[#allocation2 + $0x298] sm:$0xff] }
  0x4a   : > { %1354 = vmatpush3.msra.mxu1 %v230_v42  ;;  %449 = vmatpush1.msra.mxu0 %v228_v43  ;;  %v751_v27 = vld [vmem:[#allocation2 + $0x288] sm:$0xff]  ;;  %v749_v28 = vld [vmem:[#allocation2 + $0x278] sm:$0xff]  ;;  %v750_v29 = vld [vmem:[#allocation2 + $0x280] sm:$0xff] }
  0x4b   : > { %1355 = vmatprep.subr.mxu1 %v1576_v0  ;;  %450 = vmatprep.subr.mxu0 %v226_v44  ;;  %v748_v30 = vld [vmem:[#allocation2 + $0x270] sm:$0xff]  ;;  %v746_v31 = vld [vmem:[#allocation2 + $0x260] sm:$0xff]  ;;  %v747_v32 = vld [vmem:[#allocation2 + $0x268] sm:$0xff] }
  0x4c   : > { %1356 = vmatpush3.msra.mxu1 %v227_v45  ;;  %451 = vmatpush1.msra.mxu0 %v225_v46  ;;  %v745_v33 = vld [vmem:[#allocation2 + $0x258] sm:$0xff]  ;;  %v743_v34 = vld [vmem:[#allocation2 + $0x248] sm:$0xff]  ;;  %v744_v35 = vld [vmem:[#allocation2 + $0x250] sm:$0xff] }
  0x4d   : > { %1357 = vmatprep.subr.mxu1 %v1576_v0  ;;  %452 = vmatprep.subr.mxu0 %v223_v47  ;;  %v742_v36 = vld [vmem:[#allocation2 + $0x240] sm:$0xff]  ;;  %v963_v38 = vld [vmem:[#allocation4 + $0x178] sm:$0xff]  ;;  %v962_v39 = vld [vmem:[#allocation4 + $0x170] sm:$0xff] }
  0x4e   : > { %1358 = vmatpush3.msra.mxu1 %v224_v48  ;;  %1359 = vmatprep.mubr.msk.f32.mxu1 %vm1577_vm0, %v1576_v0  ;;  %v1230_v37 = vld [vmem:[%s1682_s10 + $0x3] sm:$0xff]  ;;  %v947_v40 = vld [vmem:[#allocation4 + $0xf8] sm:$0xff]  ;;  %v946_v42 = vld [vmem:[#allocation4 + $0xf0] sm:$0xff] }
  0x4f   : > { %453 = vmatpush1.msra.mxu0 %v222_v49  ;;  %486 = vmatprep.mubr.f32.mxu0 %v1576_v0  ;;  %v931_v41 = vld [vmem:[#allocation4 + $0x78] sm:$0xff]  ;;  %v961_v43 = vld [vmem:[#allocation4 + $0x168] sm:$0xff]  ;;  %v930_v44 = vld [vmem:[#allocation4 + $0x70] sm:$0xff] }
  0x50   : > { %1360 = vmatmul.mubr.msk.f32.vlgmr.msra.gmra.mxu1 %vm274_vm1, %v221_v50  ;;  %1362 = vmatprep.subr.mxu1 %v1576_v0  ;;  %v945_v45 = vld [vmem:[#allocation4 + $0xe8] sm:$0xff]  ;;  %v960_v47 = vld [vmem:[#allocation4 + $0x160] sm:$0xff]  ;;  %v959_v49 = vld [vmem:[#allocation4 + $0x158] sm:$0xff] }
  0x51   : > { %1225 = vmatmul.mubr.msk.f32.vlgmr.msra.gmra.mxu0 %vm274_vm1, %v221_v50  ;;  %610 = vmatprep.subr.mxu0 %v589_v51  ;;  %v929_v46 = vld [vmem:[#allocation4 + $0x68] sm:$0xff]  ;;  %v944_v48 = vld [vmem:[#allocation4 + $0xe0] sm:$0xff]  ;;  %v958_v51 = vld [vmem:[#allocation4 + $0x150] sm:$0xff] }
  0x52   : > { %1363 = vmatpush3.msra.mxu1 %v590_v52  ;;  %611 = vmatpush1.msra.mxu0 %v588_v53  ;;  %v928_v50 = vld [vmem:[#allocation4 + $0x60] sm:$0xff]  ;;  %v943_v52 = vld [vmem:[#allocation4 + $0xd8] sm:$0xff] }
  0x53   : > { %1364 = vmatprep.subr.mxu1 %v1576_v0  ;;  %612 = vmatprep.subr.mxu0 %v586_v54  ;;  %v927_v53 = vld [vmem:[#allocation4 + $0x58] sm:$0xff]  ;;  %v957_v54 = vld [vmem:[#allocation4 + $0x148] sm:$0xff] }
  0x54   : > { %1365 = vmatpush3.msra.mxu1 %v587_v55  ;;  %613 = vmatpush1.msra.mxu0 %v585_v56  ;;  %v942_v55 = vld [vmem:[#allocation4 + $0xd0] sm:$0xff] }
  0x55   : > { %1366 = vmatprep.subr.mxu1 %v1576_v0  ;;  %614 = vmatprep.subr.mxu0 %v583_v57  ;;  %v926_v56 = vld [vmem:[#allocation4 + $0x50] sm:$0xff]  ;;  %v956_v57 = vld [vmem:[#allocation4 + $0x140] sm:$0xff] }
  0x56   : > { %1367 = vmatpush3.msra.mxu1 %v584_v58  ;;  %615 = vmatpush1.msra.mxu0 %v582_v59  ;;  %v941_v58 = vld [vmem:[#allocation4 + $0xc8] sm:$0xff] }
  0x57   : > { %1368 = vmatprep.subr.mxu1 %v1576_v0  ;;  %616 = vmatprep.subr.mxu0 %v580_v60  ;;  %v925_v59 = vld [vmem:[#allocation4 + $0x48] sm:$0xff]  ;;  %v955_v60 = vld [vmem:[#allocation4 + $0x138] sm:$0xff] }
  0x58   : > { %1369 = vmatpush3.msra.mxu1 %v581_v61  ;;  %617 = vmatpush1.msra.mxu0 %v579_v62  ;;  %v940_v61 = vld [vmem:[#allocation4 + $0xc0] sm:$0xff] }
  0x59   : > { %1370 = vmatprep.subr.mxu1 %v1576_v0  ;;  %618 = vmatprep.subr.mxu0 %v577_v63  ;;  %v924_v62 = vld [vmem:[#allocation4 + $0x40] sm:$0xff]  ;;  %v954_v63 = vld [vmem:[#allocation4 + $0x130] sm:$0xff] }
  0x5a   : > { %1371 = vmatpush3.msra.mxu1 %v578_v1  ;;  %619 = vmatpush1.msra.mxu0 %v576_v2  ;;  %v939_v1 = vld [vmem:[#allocation4 + $0xb8] sm:$0xff] }
  0x5b   : > { %1372 = vmatprep.subr.mxu1 %v1576_v0  ;;  %620 = vmatprep.subr.mxu0 %v574_v3  ;;  %v923_v2 = vld [vmem:[#allocation4 + $0x38] sm:$0xff]  ;;  %v953_v3 = vld [vmem:[#allocation4 + $0x128] sm:$0xff] }
  0x5c   : > { %1373 = vmatpush3.msra.mxu1 %v575_v4  ;;  %621 = vmatpush1.msra.mxu0 %v573_v5  ;;  %v938_v4 = vld [vmem:[#allocation4 + $0xb0] sm:$0xff] }
  0x5d   : > { %1374 = vmatprep.subr.mxu1 %v1576_v0  ;;  %622 = vmatprep.subr.mxu0 %v571_v6  ;;  %v922_v5 = vld [vmem:[#allocation4 + $0x30] sm:$0xff]  ;;  %v952_v6 = vld [vmem:[#allocation4 + $0x120] sm:$0xff] }
  0x5e   : > { %1375 = vmatpush3.msra.mxu1 %v572_v7  ;;  %623 = vmatpush1.msra.mxu0 %v570_v8  ;;  %v937_v7 = vld [vmem:[#allocation4 + $0xa8] sm:$0xff] }
  0x5f   : > { %1376 = vmatprep.subr.mxu1 %v1576_v0  ;;  %624 = vmatprep.subr.mxu0 %v568_v9  ;;  %v921_v8 = vld [vmem:[#allocation4 + $0x28] sm:$0xff]  ;;  %v951_v9 = vld [vmem:[#allocation4 + $0x118] sm:$0xff] }
  0x60   : > { %1377 = vmatpush3.msra.mxu1 %v569_v10  ;;  %1378 = vmatprep.mubr.msk.f32.mxu1 %vm1577_vm0, %v1576_v0  ;;  %v936_v10 = vld [vmem:[#allocation4 + $0xa0] sm:$0xff] }
  0x61   : > { %625 = vmatpush1.msra.mxu0 %v567_v11  ;;  %658 = vmatprep.mubr.f32.mxu0 %v1576_v0  ;;  %v920_v11 = vld [vmem:[#allocation4 + $0x20] sm:$0xff] }
  0x62   : > { %1379 = vmatmul.mubr.msk.f32.vlgmr.msra.gmra.mxu1 %vm274_vm1, %v1227_v12  ;;  %1381 = vmatprep.subr.mxu1 %v1576_v0 }
  0x63   : > { %1228 = vmatmul.mubr.msk.f32.vlgmr.msra.gmra.mxu0 %vm274_vm1, %v1227_v12  ;;  %785 = vmatprep.subr.mxu0 %v764_v13  ;;  %v950_v12 = vld [vmem:[#allocation4 + $0x110] sm:$0xff]  ;;  %v935_v13 = vld [vmem:[#allocation4 + $0x98] sm:$0xff] }
  0x64   : > { %1382 = vmatpush3.msra.mxu1 %v765_v14  ;;  %786 = vmatpush1.msra.mxu0 %v763_v15  ;;  %v919_v14 = vld [vmem:[#allocation4 + $0x18] sm:$0xff]  ;;  %v949_v15 = vld [vmem:[#allocation4 + $0x108] sm:$0xff] }
  0x65   : > { %1383 = vmatprep.subr.mxu1 %v1576_v0  ;;  %787 = vmatprep.subr.mxu0 %v761_v16  ;;  %v934_v16 = vld [vmem:[#allocation4 + $0x90] sm:$0xff] }
  0x66   : > { %1384 = vmatpush3.msra.mxu1 %v762_v17  ;;  %788 = vmatpush1.msra.mxu0 %v760_v18  ;;  %v918_v17 = vld [vmem:[#allocation4 + $0x10] sm:$0xff]  ;;  %v948_v18 = vld [vmem:[#allocation4 + $0x100] sm:$0xff] }
  0x67   : > { %1385 = vmatprep.subr.mxu1 %v1576_v0  ;;  %789 = vmatprep.subr.mxu0 %v758_v19  ;;  %v933_v19 = vld [vmem:[#allocation4 + $0x88] sm:$0xff] }
  0x68   : > { %1386 = vmatpush3.msra.mxu1 %v759_v20  ;;  %790 = vmatpush1.msra.mxu0 %v757_v21  ;;  %v917_v20 = vld [vmem:[#allocation4 + $0x8] sm:$0xff]  ;;  %v932_v21 = vld [vmem:[#allocation4 + $0x80] sm:$0xff] }
  0x69   : > { %1387 = vmatprep.subr.mxu1 %v1576_v0  ;;  %791 = vmatprep.subr.mxu0 %v755_v22  ;;  %v916_v22 = vld [vmem:[#allocation4] sm:$0xff] }
  0x6a   : > { %1388 = vmatpush3.msra.mxu1 %v756_v23  ;;  %792 = vmatpush1.msra.mxu0 %v754_v24 }
  0x6b   : > { %1389 = vmatprep.subr.mxu1 %v1576_v0  ;;  %793 = vmatprep.subr.mxu0 %v752_v25 }
  0x6c   : > { %1390 = vmatpush3.msra.mxu1 %v753_v26  ;;  %794 = vmatpush1.msra.mxu0 %v751_v27 }
  0x6d   : > { %1391 = vmatprep.subr.mxu1 %v1576_v0  ;;  %795 = vmatprep.subr.mxu0 %v749_v28 }
  0x6e   : > { %1392 = vmatpush3.msra.mxu1 %v750_v29  ;;  %796 = vmatpush1.msra.mxu0 %v748_v30 }
  0x6f   : > { %1393 = vmatprep.subr.mxu1 %v1576_v0  ;;  %797 = vmatprep.subr.mxu0 %v746_v31 }
  0x70   : > { %1394 = vmatpush3.msra.mxu1 %v747_v32  ;;  %798 = vmatpush1.msra.mxu0 %v745_v33 }
  0x71   : > { %1395 = vmatprep.subr.mxu1 %v1576_v0  ;;  %799 = vmatprep.subr.mxu0 %v743_v34 }
  0x72   : > { %1396 = vmatpush3.msra.mxu1 %v744_v35  ;;  %1397 = vmatprep.mubr.msk.f32.mxu1 %vm1577_vm0, %v1576_v0 }
  0x73   : > { %800 = vmatpush1.msra.mxu0 %v742_v36  ;;  %833 = vmatprep.mubr.f32.mxu0 %v1576_v0 }
  0x74   : > { %1398 = vmatmul.mubr.msk.f32.vlgmr.msra.gmra.mxu1 %vm274_vm1, %v1230_v37  ;;  %1231 = vmatmul.mubr.msk.f32.vlgmr.msra.gmra.mxu0 %vm274_vm1, %v1230_v37 }
  0x75   : > { %1400 = vmatprep.subr.mxu1 %v1576_v0  ;;  %1432 = vmatprep.mubr.msk.f32.mxu1 %vm1577_vm0, %v1576_v0 }
  0x76   : > { %1401 = vmatpush3.msra.mxu1 %v963_v38  ;;  %1272 = vmatprep.subr.mxu0 %v947_v40 }
  0x77   : > { %1402 = vmatprep.subr.mxu1 %v1576_v0  ;;  %1273 = vmatpush3.msra.mxu0 %v931_v41 }
  0x78   : > { %1403 = vmatpush3.msra.mxu1 %v962_v39  ;;  %1274 = vmatprep.subr.mxu0 %v946_v42 }
  0x79   : > { %1404 = vmatprep.subr.mxu1 %v1576_v0  ;;  %1275 = vmatpush3.msra.mxu0 %v930_v44 }
  0x7a   : > { %1405 = vmatpush3.msra.mxu1 %v961_v43  ;;  %1276 = vmatprep.subr.mxu0 %v945_v45 }
  0x7b   : > { %1406 = vmatprep.subr.mxu1 %v1576_v0  ;;  %1277 = vmatpush3.msra.mxu0 %v929_v46 }
  0x7c   : > { %1407 = vmatpush3.msra.mxu1 %v960_v47  ;;  %1278 = vmatprep.subr.mxu0 %v944_v48 }
  0x7d   : > { %1408 = vmatprep.subr.mxu1 %v1576_v0  ;;  %1279 = vmatpush3.msra.mxu0 %v928_v50 }
  0x7e   : > { %1409 = vmatpush3.msra.mxu1 %v959_v49  ;;  %1280 = vmatprep.subr.mxu0 %v943_v52 }
  0x7f   : > { %1410 = vmatprep.subr.mxu1 %v1576_v0  ;;  %1281 = vmatpush3.msra.mxu0 %v927_v53 }
  0x80   : > { %1411 = vmatpush3.msra.mxu1 %v958_v51  ;;  %1282 = vmatprep.subr.mxu0 %v942_v55 }
  0x81   : > { %1412 = vmatprep.subr.mxu1 %v1576_v0  ;;  %1283 = vmatpush3.msra.mxu0 %v926_v56 }
  0x82   : > { %1413 = vmatpush3.msra.mxu1 %v957_v54  ;;  %1284 = vmatprep.subr.mxu0 %v941_v58 }
  0x83   : > { %1414 = vmatprep.subr.mxu1 %v1576_v0  ;;  %1285 = vmatpush3.msra.mxu0 %v925_v59 }
  0x84   : > { %1415 = vmatpush3.msra.mxu1 %v956_v57  ;;  %1286 = vmatprep.subr.mxu0 %v940_v61 }
  0x85   : > { %1416 = vmatprep.subr.mxu1 %v1576_v0  ;;  %1287 = vmatpush3.msra.mxu0 %v924_v62 }
  0x86   : > { %1417 = vmatpush3.msra.mxu1 %v955_v60  ;;  %1288 = vmatprep.subr.mxu0 %v939_v1 }
  0x87   : > { %1418 = vmatprep.subr.mxu1 %v1576_v0  ;;  %1289 = vmatpush3.msra.mxu0 %v923_v2 }
  0x88   : > { %1419 = vmatpush3.msra.mxu1 %v954_v63  ;;  %1290 = vmatprep.subr.mxu0 %v938_v4 }
  0x89   : > { %1420 = vmatprep.subr.mxu1 %v1576_v0  ;;  %1291 = vmatpush3.msra.mxu0 %v922_v5 }
  0x8a   : > { %1421 = vmatpush3.msra.mxu1 %v953_v3  ;;  %1292 = vmatprep.subr.mxu0 %v937_v7 }
  0x8b   : > { %1422 = vmatprep.subr.mxu1 %v1576_v0  ;;  %1293 = vmatpush3.msra.mxu0 %v921_v8 }
  0x8c   : > { %1423 = vmatpush3.msra.mxu1 %v952_v6  ;;  %1294 = vmatprep.subr.mxu0 %v936_v10 }
  0x8d   : > { %1424 = vmatprep.subr.mxu1 %v1576_v0  ;;  %1295 = vmatpush3.msra.mxu0 %v920_v11 }
  0x8e   : > { %1425 = vmatpush3.msra.mxu1 %v951_v9  ;;  %1296 = vmatprep.subr.mxu0 %v935_v13 }
  0x8f   : > { %1426 = vmatprep.subr.mxu1 %v1576_v0  ;;  %1297 = vmatpush3.msra.mxu0 %v919_v14 }
  0x90   : > { %1427 = vmatpush3.msra.mxu1 %v950_v12  ;;  %1298 = vmatprep.subr.mxu0 %v934_v16 }
  0x91   : > { %1428 = vmatprep.subr.mxu1 %v1576_v0  ;;  %1299 = vmatpush3.msra.mxu0 %v918_v17 }
  0x92   : > { %1429 = vmatpush3.msra.mxu1 %v949_v15  ;;  %1300 = vmatprep.subr.mxu0 %v933_v19 }
  0x93   : > { %1430 = vmatprep.subr.mxu1 %v1576_v0  ;;  %1301 = vmatpush3.msra.mxu0 %v917_v20 }
  0x94   : > { %1431 = vmatpush3.msra.mxu1 %v948_v18  ;;  %1302 = vmatprep.subr.mxu0 %v932_v21 }
  0x95   : > { %1303 = vmatpush3.msra.mxu0 %v916_v22 }
  0xfe   : > { %v344_v28 = vpop.f32.mrf.mxu0 }
  0xff   : > { %v415_v23 = vpop.f32.mrf.mxu1 }
 0x100   : > { %v346_v0 = vpop.f32.mrf.mxu0 }
 0x101   : > { %v1342_v24 = vpop.f32.mrf.mxu1 }
 0x110   : > { %v559_v25 = vpop.f32.mrf.mxu1 }
 0x111   : > { %v488_v30 = vpop.f32.mrf.mxu0  ;;  %v560_v33 = vadd.f32 %v559_v25, %v415_v23 }
 0x112   : > { %v1361_v26 = vpop.f32.mrf.mxu1  ;;  %v489_v34 = vadd.f32 %v488_v30, %v344_v28 }
 0x113   : > { %v490_v31 = vpop.f32.mrf.mxu0 }
 0x114   : > { %v491_v37 = vadd.f32 %v490_v31, %v346_v0 }
 0x122   : > { %v731_v27 = vpop.f32.mrf.mxu1 }
 0x123   : > { %v660_v32 = vpop.f32.mrf.mxu0  ;;  %v737_v35 = vadd.f32 %v731_v27, %v560_v33 }
 0x124   : > { %v1380_v29 = vpop.f32.mrf.mxu1  ;;  %v735_v39 = vadd.f32 %v660_v32, %v489_v34 }
 0x125   : > { %v662_v36 = vpop.f32.mrf.mxu0 }
 0x126   : > { %v736_v42 = vadd.f32 %v662_v36, %v491_v37 }
 0x134   : > { %v906_v38 = vpop.f32.mrf.mxu1  ;;  %v835_v41 = vpop.f32.mrf.mxu0 }
 0x135   : > { %v912_v40 = vadd.f32 %v906_v38, %v737_v35  ;;  %v910_v45 = vadd.f32 %v835_v41, %v735_v39 }
 0x136   : > { %v1399_v43 = vpop.f32.mrf.mxu1  ;;  %v837_v46 = vpop.f32.mrf.mxu0 }
 0x137   : > { %v915_v44 = vmul.f32 %v912_v40, %v912_v40  ;;  %v911_v47 = vadd.f32 %v837_v46, %v736_v42  ;;  %v913_v49 = vmul.f32 %v910_v45, %v910_v45 }
 0x139   : > { %1433 = vmatmul.mubr.f32.vlgmr.msra.gmra.mxu1 %v915_v44  ;;  %v914_v48 = vmul.f32 %v911_v47, %v911_v47 }
 0x13b   : > { %1028 = vmatprep.mubr.f32.mxu0 %v914_v48 }
 0x13c   : > { %1029 = vmatmul.mubr.f32.vlgmr.msra.gmra.mxu0 %v913_v49 }
 0x1f9   : > { %v1100_v50 = vpop.f32.mrf.mxu1 }
 0x1fb   : > { %v1434_v51 = vpop.f32.mrf.mxu1 }
 0x1fc   : > { %v1304_v52 = vpop.f32.mrf.mxu0 }
 0x1fe   : > { %v1305_v53 = vpop.f32.mrf.mxu0 }
 0x1ff   : > { %v1306_v54 = vadd.f32 %v1305_v53, %v1304_v52 }
 0x201   : > { %v1101_v55 = vadd.f32 %v1306_v54, %v1100_v50 }
 0x203   : > { %1104 = vst [vmem:[%s218_s18] sm:$0xff] %v1101_v55 }
 0x204 PF: > { %s15_s14 = sadd.s32 1, %s1568_s14   ;;  %s1769_s12 = smov %s1564_s13 }
 0x205   : > { %p12_p4 = scmp.ge.s32.totalorder %s15_s14, 4   ;;  %s1770_s13 = smov %s1772_s16 }
 0x207   :  { %14 = sbr.rel (!%p12_p4) target bundleno = 3 (0x3), region = 78 }
 0x20c   :  { %1130 = vsyncpa [#allocation3], 1 }
 0x20d   :  { %1132 = vsyncpa [#allocation3 + $0x1], 1 }
 0x20e   :  { %1133 = vsyncpa [#allocation5], 1 }

</bundles_post_ra>
